<compile_context>
chip_gen: v7x
topology: tpu7x:2x2x1
jax: 0.10.0
libtpu: 0.0.40
codegen_flags: <defaults>
</compile_context>

<pallas_src>
import functools

import jax
import jax.numpy as jnp
import numpy as np
from jax.experimental import pallas as pl
from jax.experimental.pallas import tpu as pltpu


def _round_up(a, b):
    return pl.cdiv(a, b) * b


def _rm_loss_kernel(xr_ref, gr_ref, wr_ref, xc_ref, gc_ref, out_ref, *,
                    beta, tm, tn):
    """One (tm x tn) tile of the N x N pair matrix.

    Rows play the 'pos' role (index i), cols the 'neg' role (index j); a pair
    contributes iff i < j and both indices belong to the same group. Per-row
    weight wr = 1 / (pairs_in_group * num_groups) implements mean-over-pairs
    then mean-over-groups.
    """
    i = pl.program_id(0)
    j = pl.program_id(1)

    # Output block depends only on i -> resident accumulator across the j axis.
    @pl.when(j == 0)
    def _():
        out_ref[...] = jnp.zeros_like(out_ref)

    # Skip tiles entirely on/below the diagonal: no (i < j) pairs there.
    @pl.when(i * tm < (j + 1) * tn)
    def _():
        xr = xr_ref[...].astype(jnp.float32)   # (tm, 1)  scores (pos side)
        xc = xc_ref[...].astype(jnp.float32)   # (1, tn)  scores (neg side)
        gr = gr_ref[...]                       # (tm, 1)  int32 group id (-1 pad)
        gc = gc_ref[...]                       # (1, tn)  int32 group id (-2 pad)
        wr = wr_ref[...]                       # (tm, 1)  per-row pair weight

        # Global indices for the strict upper-triangle condition.
        ri = i * tm + jax.lax.broadcasted_iota(jnp.int32, (tm, 1), 0)
        cj = j * tn + jax.lax.broadcasted_iota(jnp.int32, (1, tn), 1)
        mask = (ri < cj) & (gr == gc)          # (tm, tn) bool

        d = xr - xc                            # pos - neg
        # -logsigmoid(d) = softplus(-d), numerically stable form.
        sp = jnp.maximum(-d, 0.0) + jnp.log(1.0 + jnp.exp(-jnp.abs(d)))
        term = sp + (0.5 * beta) * (xr * xr + xc * xc)
        weighted = jnp.where(mask, wr * term, 0.0)

        # Sublane-aligned partial reduce (tm, tn) -> (8, tn): pure VPU adds,
        # keeps the accumulator vreg-shaped; scalar reduce deferred to wrapper.
        part = weighted[0:8, :]
        for r in range(1, tm // 8):
            part = part + weighted[r * 8:(r + 1) * 8, :]
        out_ref[...] = out_ref[...] + part


def rm_loss(logits, cu_lengths=None, *, beta=0.001, reduction="mean",
            tm=256, tn=256):
    """RMLoss forward. logits: 1-D (or flattenable) reward scores."""
    x = jnp.asarray(logits).reshape(-1).astype(jnp.float32)
    n = int(x.shape[0])
    if cu_lengths is None:
        cu_lengths = [0, n]
    cu = [int(c) for c in cu_lengths]
    num_groups = len(cu) - 1

    if reduction == "none":
        # TODO(synk): per-group loss vector (variable-length groups) not wired
        #             into the single-scalar reduction kernel; 'mean' only.
        raise NotImplementedError("reduction='none' not supported in this kernel")

    # Host-side (static) group ids and per-row pair weights.
    gid = np.full((n,), -1, np.int32)
    invp = np.zeros((n,), np.float32)
    for g, (s, e) in enumerate(zip(cu[:-1], cu[1:])):
        length = e - s
        pairs = length * (length - 1) // 2
        gid[s:e] = g
        if pairs > 0:
            invp[s:e] = 1.0 / (pairs * num_groups)

    # Tile sizes: large by default, clamped to the (padded) problem size.
    tm = max(8, min(tm, int(_round_up(n, 8))))
    tn = max(128, min(tn, int(_round_up(n, 128))))
    nr = int(_round_up(n, tm))
    nc = int(_round_up(n, tn))
    nti = nr // tm
    ntj = nc // tn

    # Row-side (sublane axis) and col-side (lane axis) operands.
    # Padding here is O(N) scalars (cheap); padded group ids never match
    # (-1 rows vs -2 cols vs >=0 real), so padded entries are masked out.
    xr = jnp.zeros((nr, 1), jnp.float32).at[:n, 0].set(x)
    xc = jnp.zeros((1, nc), jnp.float32).at[0, :n].set(x)
    gr_np = np.full((nr, 1), -1, np.int32); gr_np[:n, 0] = gid
    gc_np = np.full((1, nc), -2, np.int32); gc_np[0, :n] = gid
    wr_np = np.zeros((nr, 1), np.float32); wr_np[:n, 0] = invp
    gr = jnp.asarray(gr_np)
    gc = jnp.asarray(gc_np)
    wr = jnp.asarray(wr_np)

    kernel = functools.partial(_rm_loss_kernel, beta=float(beta), tm=tm, tn=tn)

    cost = pl.CostEstimate(
        flops=10 * nr * nc,
        transcendentals=2 * nr * nc,
        bytes_accessed=4 * (3 * nr + 2 * nc) + 4 * nti * 8 * tn,
    )

    partials = pl.pallas_call(
        kernel,
        out_shape=jax.ShapeDtypeStruct((nti * 8, tn), jnp.float32),
        grid_spec=pltpu.PrefetchScalarGridSpec(
            num_scalar_prefetch=0,
            grid=(nti, ntj),
            in_specs=[
                pl.BlockSpec((tm, 1), lambda i, j: (i, 0)),   # scores, row side
                pl.BlockSpec((tm, 1), lambda i, j: (i, 0)),   # group id, row side
                pl.BlockSpec((tm, 1), lambda i, j: (i, 0)),   # pair weight, row side
                pl.BlockSpec((1, tn), lambda i, j: (0, j)),   # scores, col side
                pl.BlockSpec((1, tn), lambda i, j: (0, j)),   # group id, col side
            ],
            out_specs=pl.BlockSpec((8, tn), lambda i, j: (i, 0)),
        ),
        compiler_params=pltpu.CompilerParams(
            # rows independent -> parallel (both v7x TCs); cols = reduction axis.
            dimension_semantics=("parallel", "arbitrary"),
            vmem_limit_bytes=32 * 1024 * 1024,
        ),
        cost_estimate=cost,
    )(xr, gr, wr, xc, gc)

    return jnp.sum(partials)


def _rm_loss_ref(logits, cu_lengths=None, beta=0.001):
    """Pure-JAX reference matching the PyTorch RMLoss module (reduction='mean')."""
    x = jnp.asarray(logits).reshape(-1).astype(jnp.float32)
    n = int(x.shape[0])
    if cu_lengths is None:
        cu_lengths = [0, n]
    losses = []
    for s, e in zip(cu_lengths[:-1], cu_lengths[1:]):
        xs = x[s:e]
        length = e - s
        ii, jj = jnp.triu_indices(length, k=1)
        pos = xs[ii]
        neg = xs[jj]
        l2 = 0.5 * (pos ** 2 + neg ** 2)
        term = -jax.nn.log_sigmoid(pos - neg) + beta * l2
        losses.append(term.mean())
    return jnp.stack(losses).mean()


if __name__ == "__main__":
    key = jax.random.PRNGKey(0)
    n_groups, group_size = 2, 8            # 2 prompts x 8 ranked completions
    n = n_groups * group_size
    beta = 0.001

    logits = jax.random.normal(key, (n,), dtype=jnp.float32)
    cu_lengths = [0, group_size, n]

    # Grouped path.
    out = jax.block_until_ready(rm_loss(logits, cu_lengths, beta=beta))
    ref = _rm_loss_ref(logits, cu_lengths, beta=beta)
    assert jnp.allclose(out, ref, rtol=1e-5, atol=1e-5), (out, ref)

    # Default path (cu_lengths=None -> single group over the whole batch).
    out2 = jax.block_until_ready(rm_loss(logits, None, beta=beta))
    ref2 = _rm_loss_ref(logits, None, beta=beta)
    assert jnp.allclose(out2, ref2, rtol=1e-5, atol=1e-5), (out2, ref2)

    print("KERNEL_OK")
</pallas_src>

<mosaic_0001>
module attributes {stable_mosaic.version = 11 : i64} {
  func.func @_rm_loss_kernel(%arg0: i32, %arg1: i32, %arg2: memref<16x1xf32, #tpu.memory_space<vmem>>, %arg3: memref<16x1xi32, #tpu.memory_space<vmem>>, %arg4: memref<16x1xf32, #tpu.memory_space<vmem>>, %arg5: memref<1x128xf32, #tpu.memory_space<vmem>>, %arg6: memref<1x128xi32, #tpu.memory_space<vmem>>, %arg7: memref<8x128xf32, #tpu.memory_space<vmem>>) attributes {dimension_semantics = [#tpu.dimension_semantics<parallel>, #tpu.dimension_semantics<arbitrary>], iteration_bounds = array<i64: 1, 1>, scalar_prefetch = 0 : i64, scratch_operands = 0 : i64, tpu.core_type = #tpu.core_type<tc>, window_params = [{transform_indices = @transform_0, window_bounds = array<i64: 16, 1>}, {transform_indices = @transform_1, window_bounds = array<i64: 16, 1>}, {transform_indices = @transform_2, window_bounds = array<i64: 16, 1>}, {transform_indices = @transform_3, window_bounds = array<i64: 1, 128>}, {transform_indices = @transform_4, window_bounds = array<i64: 1, 128>}, {transform_indices = @transform_5, window_bounds = array<i64: 8, 128>}]} {
    %c0_i32 = arith.constant 0 : i32
    %0 = arith.cmpi eq, %arg1, %c0_i32 : i32
    %1 = arith.extui %0 : i1 to i32
    %c0_i32_0 = arith.constant 0 : i32
    %2 = arith.cmpi ne, %1, %c0_i32_0 : i32
    scf.if %2 {
      %cst = arith.constant 0.000000e+00 : f32
      %9 = vector.broadcast %cst : f32 to vector<8x128xf32>
      %c0 = arith.constant 0 : index
      %c0_2 = arith.constant 0 : index
      %10 = vector.load %arg7[%c0, %c0_2] : memref<8x128xf32, #tpu.memory_space<vmem>>, vector<8x128xf32>
      tpu.vector_store %arg7[%c0, %c0_2], %9 {strides = array<i32>} : memref<8x128xf32, #tpu.memory_space<vmem>>, vector<8x128xf32>,
    } else {
    }
    %c16_i32 = arith.constant 16 : i32
    %3 = arith.muli %arg0, %c16_i32 : i32
    %c1_i32 = arith.constant 1 : i32
    %4 = arith.addi %arg1, %c1_i32 : i32
    %c128_i32 = arith.constant 128 : i32
    %5 = arith.muli %4, %c128_i32 : i32
    %6 = arith.cmpi slt, %3, %5 : i32
    %7 = arith.extui %6 : i1 to i32
    %c0_i32_1 = arith.constant 0 : i32
    %8 = arith.cmpi ne, %7, %c0_i32_1 : i32
    scf.if %8 {
      %c0 = arith.constant 0 : index
      %c0_2 = arith.constant 0 : index
      %9 = vector.load %arg2[%c0, %c0_2] : memref<16x1xf32, #tpu.memory_space<vmem>>, vector<16x1xf32>
      %c0_3 = arith.constant 0 : index
      %c0_4 = arith.constant 0 : index
      %10 = vector.load %arg5[%c0_3, %c0_4] : memref<1x128xf32, #tpu.memory_space<vmem>>, vector<1x128xf32>
      %c0_5 = arith.constant 0 : index
      %c0_6 = arith.constant 0 : index
      %11 = vector.load %arg3[%c0_5, %c0_6] : memref<16x1xi32, #tpu.memory_space<vmem>>, vector<16x1xi32>
      %c0_7 = arith.constant 0 : index
      %c0_8 = arith.constant 0 : index
      %12 = vector.load %arg6[%c0_7, %c0_8] : memref<1x128xi32, #tpu.memory_space<vmem>>, vector<1x128xi32>
      %c0_9 = arith.constant 0 : index
      %c0_10 = arith.constant 0 : index
      %13 = vector.load %arg4[%c0_9, %c0_10] : memref<16x1xf32, #tpu.memory_space<vmem>>, vector<16x1xf32>
      %c16_i32_11 = arith.constant 16 : i32
      %14 = arith.muli %arg0, %c16_i32_11 : i32
      %15 = tpu.iota {dimensions = array<i32: 0>} : vector<16x1xi32>
      %16 = vector.broadcast %14 : i32 to vector<16x1xi32>
      %17 = arith.addi %16, %15 : vector<16x1xi32>
      %c128_i32_12 = arith.constant 128 : i32
      %18 = arith.muli %arg1, %c128_i32_12 : i32
      %19 = tpu.iota {dimensions = array<i32: 1>} : vector<1x128xi32>
      %20 = vector.broadcast %18 : i32 to vector<1x128xi32>
      %21 = arith.addi %20, %19 : vector<1x128xi32>
      %22 = vector.broadcast %17 : vector<16x1xi32> to vector<16x128xi32>
      %23 = vector.broadcast %21 : vector<1x128xi32> to vector<16x128xi32>
      %24 = arith.cmpi slt, %22, %23 : vector<16x128xi32>
      %25 = vector.broadcast %11 : vector<16x1xi32> to vector<16x128xi32>
      %26 = vector.broadcast %12 : vector<1x128xi32> to vector<16x128xi32>
      %27 = arith.cmpi eq, %25, %26 : vector<16x128xi32>
      %28 = arith.andi %24, %27 : vector<16x128xi1>
      %29 = vector.broadcast %9 : vector<16x1xf32> to vector<16x128xf32>
      %30 = vector.broadcast %10 : vector<1x128xf32> to vector<16x128xf32>
      %31 = arith.subf %29, %30 : vector<16x128xf32>
      %cst = arith.constant 0.000000e+00 : f32
      %32 = vector.broadcast %cst : f32 to vector<16x128xf32>
      %33 = arith.subf %32, %31 : vector<16x128xf32>
      %cst_13 = arith.constant 0.000000e+00 : f32
      %34 = vector.broadcast %cst_13 : f32 to vector<16x128xf32>
      %35 = arith.maximumf %33, %34 : vector<16x128xf32>
      %36 = math.absf %31 : vector<16x128xf32>
      %cst_14 = arith.constant 0.000000e+00 : f32
      %37 = vector.broadcast %cst_14 : f32 to vector<16x128xf32>
      %38 = arith.subf %37, %36 : vector<16x128xf32>
      %39 = math.exp %38 : vector<16x128xf32>
      %cst_15 = arith.constant 1.000000e+00 : f32
      %40 = vector.broadcast %cst_15 : f32 to vector<16x128xf32>
      %41 = arith.addf %40, %39 : vector<16x128xf32>
      %42 = math.log %41 : vector<16x128xf32>
      %43 = arith.addf %35, %42 : vector<16x128xf32>
      %44 = arith.mulf %9, %9 : vector<16x1xf32>
      %45 = arith.mulf %10, %10 : vector<1x128xf32>
      %46 = vector.broadcast %44 : vector<16x1xf32> to vector<16x128xf32>
      %47 = vector.broadcast %45 : vector<1x128xf32> to vector<16x128xf32>
      %48 = arith.addf %46, %47 : vector<16x128xf32>
      %cst_16 = arith.constant 5.000000e-04 : f32
      %49 = vector.broadcast %cst_16 : f32 to vector<16x128xf32>
      %50 = arith.mulf %49, %48 : vector<16x128xf32>
      %51 = arith.addf %43, %50 : vector<16x128xf32>
      %52 = vector.broadcast %13 : vector<16x1xf32> to vector<16x128xf32>
      %53 = arith.mulf %52, %51 : vector<16x128xf32>
      %cst_17 = arith.constant 0.000000e+00 : f32
      %54 = vector.broadcast %cst_17 : f32 to vector<16x128xf32>
      %55 = arith.select %28, %53, %54 : vector<16x128xi1>, vector<16x128xf32>
      %56 = vector.extract_strided_slice %55 {offsets = [0, 0], sizes = [8, 128], strides = [1, 1]} : vector<16x128xf32> to vector<8x128xf32>
      %57 = vector.extract_strided_slice %55 {offsets = [8, 0], sizes = [8, 128], strides = [1, 1]} : vector<16x128xf32> to vector<8x128xf32>
      %58 = arith.addf %56, %57 : vector<8x128xf32>
      %c0_18 = arith.constant 0 : index
      %c0_19 = arith.constant 0 : index
      %59 = vector.load %arg7[%c0_18, %c0_19] : memref<8x128xf32, #tpu.memory_space<vmem>>, vector<8x128xf32>
      %60 = arith.addf %59, %58 : vector<8x128xf32>
      %c0_20 = arith.constant 0 : index
      %c0_21 = arith.constant 0 : index
      %61 = vector.load %arg7[%c0_20, %c0_21] : memref<8x128xf32, #tpu.memory_space<vmem>>, vector<8x128xf32>
      tpu.vector_store %arg7[%c0_20, %c0_21], %60 {strides = array<i32>} : memref<8x128xf32, #tpu.memory_space<vmem>>, vector<8x128xf32>,
    } else {
    }
    return
  }
  func.func @transform_0(%arg0: i32, %arg1: i32) -> (i32, i32) {
    %c0_i32 = arith.constant 0 : i32
    %c0_i32_0 = arith.constant 0 : i32
    return %arg0, %c0_i32 : i32, i32
  }
  func.func @transform_1(%arg0: i32, %arg1: i32) -> (i32, i32) {
    %c0_i32 = arith.constant 0 : i32
    %c0_i32_0 = arith.constant 0 : i32
    return %arg0, %c0_i32 : i32, i32
  }
  func.func @transform_2(%arg0: i32, %arg1: i32) -> (i32, i32) {
    %c0_i32 = arith.constant 0 : i32
    %c0_i32_0 = arith.constant 0 : i32
    return %arg0, %c0_i32 : i32, i32
  }
  func.func @transform_3(%arg0: i32, %arg1: i32) -> (i32, i32) {
    %c0_i32 = arith.constant 0 : i32
    %c0_i32_0 = arith.constant 0 : i32
    return %c0_i32, %arg1 : i32, i32
  }
  func.func @transform_4(%arg0: i32, %arg1: i32) -> (i32, i32) {
    %c0_i32 = arith.constant 0 : i32
    %c0_i32_0 = arith.constant 0 : i32
    return %c0_i32, %arg1 : i32, i32
  }
  func.func @transform_5(%arg0: i32, %arg1: i32) -> (i32, i32) {
    %c0_i32 = arith.constant 0 : i32
    %c0_i32_0 = arith.constant 0 : i32
    return %arg0, %c0_i32 : i32, i32
  }
}

</mosaic_0001>

<bundles_post_ra>
// kernel: tpu_custom_call.1
= control target key start
LH: loop header
LB: loop body
LE: loop exit
PB: predicated region body
PF: predicated region fallthrough
CT: control target
= control target key end

     0   :  { %v201_v1 = vmov 0   ;;  %s269_s0 = inlined_call_operand.vmem [shape: f32[16,1], index: 0, kind: input, shape index: {}]   ;;  %s270_s1 = inlined_call_operand.vmem [shape: s32[16,1], index: 1, kind: input, shape index: {}]   ;;  %s271_s2 = inlined_call_operand.vmem [shape: f32[16,1], index: 2, kind: input, shape index: {}]   ;;  %s272_s3 = inlined_call_operand.vmem [shape: f32[1,128], index: 3, kind: input, shape index: {}]   ;;  %s273_s4 = inlined_call_operand.vmem [shape: s32[1,128], index: 4, kind: input, shape index: {}]   ;;  %s274_s5 = inlined_call_operand.hbm [shape: f32[8,128], index: 5, kind: output, shape index: {}]  }
   0x1   :  { %v33_v0 = vld [vmem:[%s269_s0] sm:$0xff]  ;;  %167 = vset.pattern.permute.xlu0 %v201_v1  ;;  %168 = vset.pattern.permute.xlu1 %v201_v1  ;;  %v34_v3 = vld [vmem:[%s269_s0 + $0x8] sm:$0xff] }
   0x2   :  { %v106_v2 = vmul.f32 %v33_v0, %v33_v0  ;;  %70 = vperm.xlu0 %167, %v33_v0  }
   0x3   :  { %10 = vsyncpa [#allocation3], 0  ;;  %v107_v4 = vmul.f32 %v34_v3, %v34_v3  ;;  %v36_v5 = vld [vmem:[%s270_s1] sm:$0xff]  ;;  %v37_v6 = vld [vmem:[%s270_s1 + $0x8] sm:$0xff]  ;;  %v41_v9 = vlaneseq }
   0x4   :  { %111 = vperm.xlu1 %168, %v106_v2   ;;  %v39_v7 = vld [vmem:[%s271_s2] sm:$0xff]  ;;  %v40_v8 = vld [vmem:[%s271_s2 + $0x8] sm:$0xff] }
   0x5   :  { %v42_v10 = vshrl.u32 %v41_v9, 7  ;;  %v35_v12 = vld [vmem:[%s272_s3] sm:$0x1]  ;;  %v49_v43 = vand.u32 127, %v41_v9  ;;  %s202_s3 = smov [#allocation2]  }
   0x6   :  { %75 = vperm.xlu0 %167, %v34_v3   ;;  %v108_v27 = vmul.f32 %v35_v12, %v35_v12  ;;  %v163_v46 = vld [vmem:[%s273_s4] ss:$0 sm:$0xff]  ;;  %s155_s4 = sshll.u32 %s202_s3, 4  ;;  %s156_s4 = int_to_ptr.vmem [resolvable:$true] %s155_s4 }
   0x7   :  { %v81_v11 = vsub.s32 0, %v42_v10  ;;  %v43_v48 = vadd.s32 8, %v42_v10  ;;  %vm52_vm0 = vcmp.lt.s32.totalorder %v42_v10, %v49_v43  ;;  %s177_s6 = scalar_lea.vmem %s156_s4, 128  ;;  %p182_p1 = scmp.lt.s32.totalorder %s156_s4, %s156_s4 }
   0x8   :  { %116 = vperm.xlu1 %168, %v107_v4   ;;  %p178_p0 = scmp.ne.s32.totalorder %s156_s4, %s177_s6  ;;  %p183_p2 = scmp.lt.s32.totalorder %s177_s6, %s177_s6 }
   0x9   :  { %v82_v13 = vrot.slane %v35_v12, %v81_v11  ;;  %v123_v30 = vrot.slane %v108_v27, %v81_v11  ;;  %vm53_vm2 = vcmp.lt.s32.totalorder %v43_v48, %v49_v43 }
   0xa   :  { %55 = vperm.xlu0 %167, %v36_v5   ;;  %p184_p3 = por %p183_p2, %p182_p1 }
   0xc   :  { %58 = vperm.xlu1 %168, %v37_v6   ;;  %p185_p4 = pnand %p184_p3, %p178_p0 }
   0xe   :  { %133 = vperm.xlu0 %167, %v39_v7  }
  0x10   :  { %138 = vperm.xlu1 %168, %v40_v8  }
  0x81   :  { %v71_v14 = vpop.permute.xlu0 %70 }
  0x82   :  { %v84_v15 = vsub.f32 %v71_v14, %v82_v13 }
  0x83   :  { %v112_v29 = vpop.permute.xlu1 %111 }
  0x84   :  { %v90_v16 = vand.u32 2147483647, %v84_v15  ;;  %v86_v31 = vsub.f32 0.0, %v84_v15  ;;  %v125_v33 = vadd.f32 %v123_v30, %v112_v29 }
  0x85   :  { %v76_v17 = vpop.permute.xlu0 %75 }
  0x86   :  { %v92_v18 = vsub.f32 0.0, %v90_v16  ;;  %v85_v19 = vsub.f32 %v76_v17, %v82_v13  ;;  %v88_v35 = vmax.f32 %v86_v31, 0.0  ;;  %v127_v40 = vmul.f32 0.0005, %v125_v33 }
  0x87   :  { %v117_v32 = vpop.permute.xlu1 %116 }
  0x88   :  { %v94_v20 = vmul.f32 1.442695, %v92_v18  ;;  %v91_v21 = vand.u32 2147483647, %v85_v19  ;;  %v87_v36 = vsub.f32 0.0, %v85_v19  ;;  %v126_v41 = vadd.f32 %v123_v30, %v117_v32 }
  0x89   :  { %v56_v38 = vpop.permute.xlu0 %55 }
  0x8a   :  { %169 = vpow2.f32 %v94_v20  ;;  %v93_v22 = vsub.f32 0.0, %v91_v21  ;;  %v89_v45 = vmax.f32 %v87_v36, 0.0  ;;  %v128_v50 = vmul.f32 0.0005, %v126_v41 }
  0x8b   :  { %v59_v44 = vpop.permute.xlu1 %58  ;;  %vm64_vm1 = vcmp.eq.s32.totalorder %v56_v38, %v163_v46 }
  0x8c   :  { %v96_v23 = vmul.f32 1.442695, %v93_v22  ;;  %vm65_vm3 = vcmp.eq.s32.totalorder %v59_v44, %v163_v46  ;;  %vm66_vm4 = vmand %vm52_vm0, %vm64_vm1 }
  0x8d   :  { %v134_v52 = vpop.permute.xlu0 %133  ;;  %vm67_vm5 = vmand %vm53_vm2, %vm65_vm3 }
  0x8e   :  { %171 = vpow2.f32 %v96_v23 }
  0x8f   :  { %v139_v55 = vpop.permute.xlu1 %138 }
  0x94   :  { %v170_v24 = vpop.eup %169 }
  0x95   :  { %v98_v25 = vadd.f32 1.0, %v170_v24 }
  0x97   :  { %173 = vlog2.f32 %v98_v25 }
  0x98   :  { %v172_v26 = vpop.eup %171 }
  0x99   :  { %v99_v28 = vadd.f32 1.0, %v172_v26 }
  0x9b   :  { %175 = vlog2.f32 %v99_v28 }
  0xa1   :  { %v174_v34 = vpop.eup %173 }
  0xa2   :  { %v101_v37 = vmul.f32 0.6931472, %v174_v34 }
  0xa4   :  { %v104_v39 = vadd.f32 %v101_v37, %v88_v35 }
  0xa5   :  { %v176_v42 = vpop.eup %175 }
  0xa6   :  { %v129_v47 = vadd.f32 %v127_v40, %v104_v39  ;;  %v103_v49 = vmul.f32 0.6931472, %v176_v42 }
  0xa8   :  { %v105_v51 = vadd.f32 %v103_v49, %v89_v45  ;;  %v141_v53 = vmul.f32 %v134_v52, %v129_v47 }
  0xaa   :  { %v130_v54 = vadd.f32 %v128_v50, %v105_v51  ;;  %v143_v57 = vsel %vm66_vm4, %v141_v53, 0.0 }
  0xac   :  { %v142_v56 = vmul.f32 %v139_v55, %v130_v54 }
  0xae   :  { %v144_v58 = vsel %vm67_vm5, %v142_v56, 0.0 }
  0xaf   :  { %v145_v59 = vadd.f32 %v144_v58, %v143_v57 }
  0xb1   :  { %148 = vst [vmem:[#allocation2] sm:$0xff] %v145_v59 }
  0xb2   :  { %188 = shalt.err (!%p185_p4)
}
  0xb3   :  { %s189_s9 = scalar_lea.hbm %s274_s5, 128 }
  0xb4   :  { %p190_p5 = scmp.ne.s32.totalorder %s274_s5, %s189_s9  ;;  %p193_p6 = scmp.lt.u32.totalorder %s189_s9, %s274_s5 }
  0xb6   :  { %p195_p7 = pnand %p193_p6, %p190_p5 }
  0xb8   :  { %198 = shalt.err (!%p195_p7)
}
  0xb9   :  { %158 = dma.vmem_to_hbm [thread:$0]  %s156_s4, 128, %s274_s5, [#allocation3]  }
  0xba   :  { %199 = dma.done.wait [#allocation3], 128  }
  0xbb   :  { %200 = vsyncadd [#allocation3], 4294967168 }
  0xbc   :  { %162 = vsyncpa [#allocation3], 1 }

</bundles_post_ra>
